<compile_context>
chip_gen: v6e
topology: v6e:2x2x1
jax: 0.10.0
libtpu: 0.0.40
codegen_flags: <defaults>
</compile_context>

<pallas_src>
import jax
import jax.numpy as jnp
from jax.experimental import pallas as pl
from jax.experimental.pallas import tpu as pltpu

D_IN, D_H1, D_H2, D_OUT = 9, 128, 64, 9


def _round_up(n, m):
    return ((n + m - 1) // m) * m


def tictactoe_kernel(x_ref, w1_ref, b1_ref, w2_ref, b2_ref, w3_ref, b3_ref, o_ref):
    # x_ref: (tile, 9) matmul-dtype batch tile (rows past B are zero padding).
    # Weights/biases are the real shapes; MXU accumulates in f32, bias add and
    # ReLU stay in f32, activations are cast back to the matmul dtype.
    x = x_ref[...]

    # fc1 + ReLU : (tile,9) @ (9,128)
    h1 = jnp.dot(x, w1_ref[...], preferred_element_type=jnp.float32) + b1_ref[...]
    h1 = jnp.maximum(h1, 0.0).astype(w2_ref.dtype)

    # fc2 + ReLU : (tile,128) @ (128,64)
    h2 = jnp.dot(h1, w2_ref[...], preferred_element_type=jnp.float32) + b2_ref[...]
    h2 = jnp.maximum(h2, 0.0).astype(w3_ref.dtype)

    # fc3 : (tile,64) @ (64,9)  -> stored narrow (9 lanes)
    out = jnp.dot(h2, w3_ref[...], preferred_element_type=jnp.float32) + b3_ref[...]
    o_ref[...] = out.astype(o_ref.dtype)


def prepare_params(params, matmul_dtype=jnp.bfloat16):
    """Cast matmul operands (weights) once; biases stay f32.

    bf16 is the native MXU operand dtype on every TPU generation (v5e included;
    only its VPU lacks bf16, and all elementwise math here is f32).  Pass
    matmul_dtype=jnp.float32 for bit-exact nn.Linear semantics.
    """
    w1 = params["w1"].astype(matmul_dtype)   # (9, 128)
    w2 = params["w2"].astype(matmul_dtype)   # (128, 64)
    w3 = params["w3"].astype(matmul_dtype)   # (64, 9)
    b1 = params["b1"].astype(jnp.float32)    # (1, 128)
    b2 = params["b2"].astype(jnp.float32)    # (1, 64)
    b3 = params["b3"].astype(jnp.float32)    # (1, 9)
    return (w1, b1, w2, b2, w3, b3)


def tictactoe_forward(x, prepared, *, batch_tile=4096):
    """x: [B, 9] float32.  prepared: output of prepare_params().

    batch_tile: max rows per grid step (multiple of 8).  The tile is also
    capped at ~half the (8-aligned) batch so the grid has >= 2 steps whenever
    possible -- required for both v7x TensorCores to get work.
    """
    B, Din = x.shape
    assert Din == D_IN
    assert batch_tile % 8 == 0

    w1, b1, w2, b2, w3, b3 = prepared
    matmul_dtype = w1.dtype

    b8 = _round_up(B, 8)
    # Cap tile so the grid has >= 2 steps when the batch allows it (v7x: 2 TCs).
    half = max(8, _round_up((b8 + 1) // 2, 8))
    tile = min(batch_tile, half)
    b_pad = _round_up(B, tile)

    # Only a row pad (to a tile multiple); NO lane padding -- x stays 9-wide.
    x_pad = x if b_pad == B else jnp.pad(x, ((0, b_pad - B), (0, 0)))
    x_pad = x_pad.astype(matmul_dtype)

    grid = (b_pad // tile,)

    def full(arr):
        # Whole (small) parameter resident every grid step; full-array block
        # shapes are exempt from the (8,128) divisibility rule.
        # TODO(synk): pipeline_mode=pl.Buffered(1) would drop the redundant
        # second parameter buffer (minor VMEM hygiene).
        return pl.BlockSpec(arr.shape, lambda i: (0,) * arr.ndim)

    out = pl.pallas_call(
        tictactoe_kernel,
        out_shape=jax.ShapeDtypeStruct((b_pad, D_OUT), jnp.float32),
        grid_spec=pltpu.PrefetchScalarGridSpec(
            num_scalar_prefetch=0,
            grid=grid,
            in_specs=[
                pl.BlockSpec((tile, D_IN), lambda i: (i, 0)),   # narrow x tile
                full(w1), full(b1),
                full(w2), full(b2),
                full(w3), full(b3),
            ],
            out_specs=pl.BlockSpec((tile, D_OUT), lambda i: (i, 0)),  # narrow out
        ),
        compiler_params=pltpu.CompilerParams(
            dimension_semantics=("parallel",),   # batch axis shards across TCs
        ),
    )(x_pad, w1, b1, w2, b2, w3, b3)

    # Strip only the batch padding (no lane slice needed anymore).
    return out[:B]


def init_params(key):
    """Deterministic init mimicking nn.Linear's U(-1/sqrt(fan_in), 1/sqrt(fan_in))."""
    dims = [(D_IN, D_H1), (D_H1, D_H2), (D_H2, D_OUT)]
    params = {}
    keys = jax.random.split(key, 2 * len(dims))
    for idx, (fan_in, fan_out) in enumerate(dims):
        bound = 1.0 / jnp.sqrt(jnp.float32(fan_in))
        w = jax.random.uniform(keys[2 * idx], (fan_in, fan_out),
                               minval=-bound, maxval=bound, dtype=jnp.float32)
        b = jax.random.uniform(keys[2 * idx + 1], (1, fan_out),
                               minval=-bound, maxval=bound, dtype=jnp.float32)
        params[f"w{idx + 1}"] = w
        params[f"b{idx + 1}"] = b
    return params


def reference_forward(x, params):
    h1 = jnp.maximum(x @ params["w1"] + params["b1"], 0.0)
    h2 = jnp.maximum(h1 @ params["w2"] + params["b2"], 0.0)
    return h2 @ params["w3"] + params["b3"]


if __name__ == "__main__":
    key = jax.random.PRNGKey(0)
    pkey, xkey = jax.random.split(key)

    params = init_params(pkey)

    B = 32  # board states per batch; each board flattened to 9 cells
    x = jax.random.uniform(xkey, (B, D_IN), minval=-1.0, maxval=1.0, dtype=jnp.float32)
    ref = reference_forward(x, params)

    # f32 matmul path (bit-for-bit semantics of the PyTorch module)
    prep_f32 = prepare_params(params, jnp.float32)
    out_f32 = jax.block_until_ready(tictactoe_forward(x, prep_f32))
    assert out_f32.shape == (B, D_OUT)
    assert jnp.allclose(out_f32, ref, atol=1e-5, rtol=1e-5), "f32 mismatch vs reference"

    # Default bf16 matmul-operand path (native MXU dtype on all gens; f32 accum/bias/ReLU)
    prep_bf16 = prepare_params(params)  # bf16 default
    out_bf16 = jax.block_until_ready(tictactoe_forward(x, prep_bf16))
    assert out_bf16.shape == (B, D_OUT)
    assert jnp.allclose(out_bf16, ref, atol=5e-2, rtol=5e-2), "bf16 mismatch vs reference"

    print("KERNEL_OK")
</pallas_src>

<mosaic_0001>
module attributes {stable_mosaic.version = 11 : i64} {
  func.func @tictactoe_kernel(%arg0: i32, %arg1: memref<16x9xf32, #tpu.memory_space<vmem>>, %arg2: memref<9x128xf32, #tpu.memory_space<vmem>>, %arg3: memref<1x128xf32, #tpu.memory_space<vmem>>, %arg4: memref<128x64xf32, #tpu.memory_space<vmem>>, %arg5: memref<1x64xf32, #tpu.memory_space<vmem>>, %arg6: memref<64x9xf32, #tpu.memory_space<vmem>>, %arg7: memref<1x9xf32, #tpu.memory_space<vmem>>, %arg8: memref<16x9xf32, #tpu.memory_space<vmem>>) attributes {dimension_semantics = [#tpu.dimension_semantics<parallel>], iteration_bounds = array<i64: 2>, scalar_prefetch = 0 : i64, scratch_operands = 0 : i64, tpu.core_type = #tpu.core_type<tc>, window_params = [{transform_indices = @transform_0, window_bounds = array<i64: 16, 9>}, {pipeline_mode = #tpu.pipeline_mode<synchronous>, transform_indices = @transform_1, window_bounds = array<i64: 9, 128>}, {pipeline_mode = #tpu.pipeline_mode<synchronous>, transform_indices = @transform_2, window_bounds = array<i64: 1, 128>}, {pipeline_mode = #tpu.pipeline_mode<synchronous>, transform_indices = @transform_3, window_bounds = array<i64: 128, 64>}, {pipeline_mode = #tpu.pipeline_mode<synchronous>, transform_indices = @transform_4, window_bounds = array<i64: 1, 64>}, {pipeline_mode = #tpu.pipeline_mode<synchronous>, transform_indices = @transform_5, window_bounds = array<i64: 64, 9>}, {pipeline_mode = #tpu.pipeline_mode<synchronous>, transform_indices = @transform_6, window_bounds = array<i64: 1, 9>}, {transform_indices = @transform_7, window_bounds = array<i64: 16, 9>}]} {
    %c0 = arith.constant 0 : index
    %c0_0 = arith.constant 0 : index
    %0 = vector.load %arg1[%c0, %c0_0] : memref<16x9xf32, #tpu.memory_space<vmem>>, vector<16x9xf32>
    %c0_1 = arith.constant 0 : index
    %c0_2 = arith.constant 0 : index
    %1 = vector.load %arg2[%c0_1, %c0_2] : memref<9x128xf32, #tpu.memory_space<vmem>>, vector<9x128xf32>
    %cst = arith.constant dense<0.000000e+00> : vector<16x128xf32>
    %2 = tpu.matmul %0, %1, %cst {dimension_numbers = #tpu.dot_dimension_numbers<[1], [0], [0], [1], [0, 0, 1, 1], [], []>} : vector<16x9xf32>, vector<9x128xf32>, vector<16x128xf32> -> vector<16x128xf32>
    %c0_3 = arith.constant 0 : index
    %c0_4 = arith.constant 0 : index
    %3 = vector.load %arg3[%c0_3, %c0_4] : memref<1x128xf32, #tpu.memory_space<vmem>>, vector<1x128xf32>
    %4 = vector.broadcast %3 : vector<1x128xf32> to vector<16x128xf32>
    %5 = arith.addf %2, %4 : vector<16x128xf32>
    %cst_5 = arith.constant 0.000000e+00 : f32
    %6 = vector.broadcast %cst_5 : f32 to vector<16x128xf32>
    %7 = arith.maximumf %5, %6 : vector<16x128xf32>
    %c0_6 = arith.constant 0 : index
    %c0_7 = arith.constant 0 : index
    %8 = vector.load %arg4[%c0_6, %c0_7] : memref<128x64xf32, #tpu.memory_space<vmem>>, vector<128x64xf32>
    %cst_8 = arith.constant dense<0.000000e+00> : vector<16x64xf32>
    %9 = tpu.matmul %7, %8, %cst_8 {dimension_numbers = #tpu.dot_dimension_numbers<[1], [0], [0], [1], [0, 0, 1, 1], [], []>} : vector<16x128xf32>, vector<128x64xf32>, vector<16x64xf32> -> vector<16x64xf32>
    %c0_9 = arith.constant 0 : index
    %c0_10 = arith.constant 0 : index
    %10 = vector.load %arg5[%c0_9, %c0_10] : memref<1x64xf32, #tpu.memory_space<vmem>>, vector<1x64xf32>
    %11 = vector.broadcast %10 : vector<1x64xf32> to vector<16x64xf32>
    %12 = arith.addf %9, %11 : vector<16x64xf32>
    %cst_11 = arith.constant 0.000000e+00 : f32
    %13 = vector.broadcast %cst_11 : f32 to vector<16x64xf32>
    %14 = arith.maximumf %12, %13 : vector<16x64xf32>
    %c0_12 = arith.constant 0 : index
    %c0_13 = arith.constant 0 : index
    %15 = vector.load %arg6[%c0_12, %c0_13] : memref<64x9xf32, #tpu.memory_space<vmem>>, vector<64x9xf32>
    %cst_14 = arith.constant dense<0.000000e+00> : vector<16x9xf32>
    %16 = tpu.matmul %14, %15, %cst_14 {dimension_numbers = #tpu.dot_dimension_numbers<[1], [0], [0], [1], [0, 0, 1, 1], [], []>} : vector<16x64xf32>, vector<64x9xf32>, vector<16x9xf32> -> vector<16x9xf32>
    %c0_15 = arith.constant 0 : index
    %c0_16 = arith.constant 0 : index
    %17 = vector.load %arg7[%c0_15, %c0_16] : memref<1x9xf32, #tpu.memory_space<vmem>>, vector<1x9xf32>
    %18 = vector.broadcast %17 : vector<1x9xf32> to vector<16x9xf32>
    %19 = arith.addf %16, %18 : vector<16x9xf32>
    %c0_17 = arith.constant 0 : index
    %c0_18 = arith.constant 0 : index
    %20 = vector.load %arg8[%c0_17, %c0_18] : memref<16x9xf32, #tpu.memory_space<vmem>>, vector<16x9xf32>
    tpu.vector_store %arg8[%c0_17, %c0_18], %19 {strides = array<i32>} : memref<16x9xf32, #tpu.memory_space<vmem>>, vector<16x9xf32>,
    return
  }
  func.func @transform_0(%arg0: i32) -> (i32, i32) {
    %c0_i32 = arith.constant 0 : i32
    %c0_i32_0 = arith.constant 0 : i32
    return %arg0, %c0_i32 : i32, i32
  }
  func.func @transform_1(%arg0: i32) -> (i32, i32) {
    %c0_i32 = arith.constant 0 : i32
    %c0_i32_0 = arith.constant 0 : i32
    %c0_i32_1 = arith.constant 0 : i32
    return %c0_i32, %c0_i32_0 : i32, i32
  }
  func.func @transform_2(%arg0: i32) -> (i32, i32) {
    %c0_i32 = arith.constant 0 : i32
    %c0_i32_0 = arith.constant 0 : i32
    %c0_i32_1 = arith.constant 0 : i32
    return %c0_i32, %c0_i32_0 : i32, i32
  }
  func.func @transform_3(%arg0: i32) -> (i32, i32) {
    %c0_i32 = arith.constant 0 : i32
    %c0_i32_0 = arith.constant 0 : i32
    %c0_i32_1 = arith.constant 0 : i32
    return %c0_i32, %c0_i32_0 : i32, i32
  }
  func.func @transform_4(%arg0: i32) -> (i32, i32) {
    %c0_i32 = arith.constant 0 : i32
    %c0_i32_0 = arith.constant 0 : i32
    %c0_i32_1 = arith.constant 0 : i32
    return %c0_i32, %c0_i32_0 : i32, i32
  }
  func.func @transform_5(%arg0: i32) -> (i32, i32) {
    %c0_i32 = arith.constant 0 : i32
    %c0_i32_0 = arith.constant 0 : i32
    %c0_i32_1 = arith.constant 0 : i32
    return %c0_i32, %c0_i32_0 : i32, i32
  }
  func.func @transform_6(%arg0: i32) -> (i32, i32) {
    %c0_i32 = arith.constant 0 : i32
    %c0_i32_0 = arith.constant 0 : i32
    %c0_i32_1 = arith.constant 0 : i32
    return %c0_i32, %c0_i32_0 : i32, i32
  }
  func.func @transform_7(%arg0: i32) -> (i32, i32) {
    %c0_i32 = arith.constant 0 : i32
    %c0_i32_0 = arith.constant 0 : i32
    return %arg0, %c0_i32 : i32, i32
  }
}

</mosaic_0001>

<bundles_post_ra>
// kernel: tpu_custom_call.1
= control target key start
LH: loop header
LB: loop body
LE: loop exit
PB: predicated region body
PF: predicated region fallthrough
CT: control target
= control target key end

     0   :  { %s804_s24 = smov 0   ;;  %s919_s0 = inlined_call_operand.vmem [shape: f32[32,9], index: 0, kind: input, shape index: {}]   ;;  %s920_s1 = inlined_call_operand.vmem [shape: f32[9,128], index: 1, kind: input, shape index: {}]   ;;  %s921_s2 = inlined_call_operand.vmem [shape: f32[1,128], index: 2, kind: input, shape index: {}]   ;;  %s922_s3 = inlined_call_operand.vmem [shape: f32[128,64], index: 3, kind: input, shape index: {}]   ;;  %s923_s4 = inlined_call_operand.vmem [shape: f32[1,64], index: 4, kind: input, shape index: {}]   ;;  %s924_s5 = inlined_call_operand.vmem [shape: f32[64,9], index: 5, kind: input, shape index: {}]   ;;  %s925_s6 = inlined_call_operand.vmem [shape: f32[1,9], index: 6, kind: input, shape index: {}]   ;;  %s926_s7 = inlined_call_operand.vmem [shape: f32[32,9], index: 7, kind: output, shape index: {}]  }
   0x1 LB: > { %s636_s25 = sadd.s32 4294967295, %s762_s24   ;;  %p640_p0 = scmp.ge.s32.totalorder %s762_s24, 1  ;;  %s762_s24 = sphi %s804_s24, %s17_s24  }
   0x2   : > { %p238_p1 = scmp.lt.s32.totalorder %s762_s24, 3 }
   0x4   : > { %p239_p2 = pnand %p640_p0, %p238_p1 }
   0x5   : > { %s641_s30 = sshll.u32 (!%p239_p2), %s636_s25, 1 }
   0x6   : > { %242 = sbr.rel (%p239_p2) target bundleno = 615 (0x267), region = 48  ;;  %p271_p3 = scmp.lt.s32.totalorder (!%p239_p2), %s641_s30, 3 }
   0xb   : > { %v285_v0 = vld [vmem:[%s920_s1 + $0x8] sm:$0x1]  ;;  %vm300_vm0 = vcmask 1040384   ;;  %v284_v1 = vld [vmem:[%s920_s1] sm:$0xff]  ;;  %v396_v2 = vld [vmem:[%s922_s3 + $0x78] sm:$0xff]  ;;  %s928_s30 = smov (!%p271_p3, %s641_s30), 3 }
   0xc   : > { %687 = vmatprep.subr.msk.mxu0 %vm300_vm0, %v285_v0  ;;  %v395_v3 = vld [vmem:[%s922_s3 + $0x70] sm:$0xff]  ;;  %694 = vmatprep.subr.mxu1 %v396_v2  ;;  %v394_v4 = vld [vmem:[%s922_s3 + $0x68] sm:$0xff]  ;;  %s642_s14 = sshll.u32 %s928_s30, 3  ;;  %vm293_vm1 = vcmask 72704   ;;  %v393_v5 = vld [vmem:[%s922_s3 + $0x60] sm:$0xff]  ;;  %vm496_vm2 = vcmask 523264  }
   0xd   : > { %688 = vmatpush3.msk.msra.mxu0 %vm300_vm0, %v285_v0  ;;  %695 = vmatpush3.msra.mxu1 %v396_v2  ;;  %s274_s19 = scalar_lea.vmem %s919_s0, %s642_s14  ;;  %v392_v8 = vld [vmem:[%s922_s3 + $0x58] sm:$0xff]  ;;  %v391_v9 = vld [vmem:[%s922_s3 + $0x50] sm:$0xff]  ;;  %v390_v10 = vld [vmem:[%s922_s3 + $0x48] sm:$0xff]  ;;  %s280_s29 = scalar_lea.vmem %s926_s7, %s642_s14 }
   0xe   : > { %689 = vmatprep.subr.mxu0 %v284_v1  ;;  %696 = vmatprep.subr.mxu1 %v395_v3  ;;  %v282_v6 = vld [vmem:[%s274_s19] sm:$0xff]  ;;  %v283_v7 = vld [vmem:[%s274_s19 + $0x8] sm:$0xff]  ;;  %v388_v12 = vld [vmem:[%s922_s3 + $0x38] sm:$0xff] }
   0xf   : > { %690 = vmatpush3.msra.mxu0 %v284_v1  ;;  %697 = vmatpush3.msra.mxu1 %v395_v3  ;;  %v389_v11 = vld [vmem:[%s922_s3 + $0x40] sm:$0xff]  ;;  %v387_v13 = vld [vmem:[%s922_s3 + $0x30] sm:$0xff]  ;;  %v386_v14 = vld [vmem:[%s922_s3 + $0x28] sm:$0xff] }
  0x10   : > { %698 = vmatprep.subr.mxu1 %v394_v4  ;;  %691 = vmatprep.mubr.msk.f32.mxu0 %vm293_vm1, %v282_v6  ;;  %v385_v15 = vld [vmem:[%s922_s3 + $0x20] sm:$0xff]  ;;  %v384_v16 = vld [vmem:[%s922_s3 + $0x18] sm:$0xff]  ;;  %v383_v17 = vld [vmem:[%s922_s3 + $0x10] sm:$0xff] }
  0x11   : > { %699 = vmatpush3.msra.mxu1 %v394_v4  ;;  %692 = vmatmul.mubr.msk.f32.vlgmr.msra.gmra.mxu0 %vm293_vm1, %v283_v7  ;;  %v382_v18 = vld [vmem:[%s922_s3 + $0x8] sm:$0xff]  ;;  %v381_v19 = vld [vmem:[%s922_s3] sm:$0xff]  ;;  %v488_v20 = vld [vmem:[%s924_s5 + $0x38] sm:$0xff] }
  0x12   : > { %700 = vmatprep.subr.mxu1 %v393_v5  ;;  %v487_v21 = vld [vmem:[%s924_s5 + $0x30] sm:$0xff]  ;;  %729 = vmatprep.subr.mxu0 %v488_v20  ;;  %v486_v22 = vld [vmem:[%s924_s5 + $0x28] sm:$0xff]  ;;  %v485_v23 = vld [vmem:[%s924_s5 + $0x20] sm:$0xff] }
  0x13   : > { %701 = vmatpush3.msra.mxu1 %v393_v5  ;;  %730 = vmatpush3.msra.mxu0 %v488_v20  ;;  %v645_v24 = vld [vmem:[%s921_s2] ss:$0 sm:$0xff]  ;;  %v484_v31 = vld [vmem:[%s924_s5 + $0x18] sm:$0xff]  ;;  %v483_v32 = vld [vmem:[%s924_s5 + $0x10] sm:$0xff] }
  0x14   : > { %702 = vmatprep.subr.mxu1 %v392_v8  ;;  %731 = vmatprep.subr.mxu0 %v487_v21  ;;  %v482_v33 = vld [vmem:[%s924_s5 + $0x8] sm:$0xff]  ;;  %v481_v34 = vld [vmem:[%s924_s5] sm:$0xff] }
  0x15   : > { %703 = vmatpush3.msra.mxu1 %v392_v8  ;;  %732 = vmatpush3.msra.mxu0 %v487_v21  ;;  %v649_v35 = vld [vmem:[%s923_s4] ss:$0 sm:$0xff] }
  0x16   : > { %704 = vmatprep.subr.mxu1 %v391_v9  ;;  %733 = vmatprep.subr.mxu0 %v486_v22  ;;  %v650_v43 = vld [vmem:[%s925_s6] ss:$0 sm:$0xff] }
  0x17   : > { %705 = vmatpush3.msra.mxu1 %v391_v9  ;;  %734 = vmatpush3.msra.mxu0 %v486_v22 }
  0x18   : > { %706 = vmatprep.subr.mxu1 %v390_v10  ;;  %735 = vmatprep.subr.mxu0 %v485_v23 }
  0x19   : > { %707 = vmatpush3.msra.mxu1 %v390_v10  ;;  %736 = vmatpush3.msra.mxu0 %v485_v23 }
  0x1a   : > { %708 = vmatprep.subr.mxu1 %v389_v11  ;;  %737 = vmatprep.subr.mxu0 %v484_v31 }
  0x1b   : > { %709 = vmatpush3.msra.mxu1 %v389_v11  ;;  %738 = vmatpush3.msra.mxu0 %v484_v31 }
  0x1c   : > { %710 = vmatprep.subr.mxu1 %v388_v12  ;;  %739 = vmatprep.subr.mxu0 %v483_v32 }
  0x1d   : > { %711 = vmatpush3.msra.mxu1 %v388_v12  ;;  %740 = vmatpush3.msra.mxu0 %v483_v32 }
  0x1e   : > { %712 = vmatprep.subr.mxu1 %v387_v13  ;;  %741 = vmatprep.subr.mxu0 %v482_v33 }
  0x1f   : > { %713 = vmatpush3.msra.mxu1 %v387_v13  ;;  %742 = vmatpush3.msra.mxu0 %v482_v33 }
  0x20   : > { %714 = vmatprep.subr.mxu1 %v386_v14  ;;  %743 = vmatprep.subr.mxu0 %v481_v34 }
  0x21   : > { %715 = vmatpush3.msra.mxu1 %v386_v14  ;;  %744 = vmatpush3.msra.mxu0 %v481_v34 }
  0x22   : > { %716 = vmatprep.subr.mxu1 %v385_v15 }
  0x23   : > { %717 = vmatpush3.msra.mxu1 %v385_v15 }
  0x24   : > { %718 = vmatprep.subr.mxu1 %v384_v16 }
  0x25   : > { %719 = vmatpush3.msra.mxu1 %v384_v16 }
  0x26   : > { %720 = vmatprep.subr.mxu1 %v383_v17 }
  0x27   : > { %721 = vmatpush3.msra.mxu1 %v383_v17 }
  0x28   : > { %722 = vmatprep.subr.mxu1 %v382_v18 }
  0x29   : > { %723 = vmatpush3.msra.mxu1 %v382_v18 }
  0x2a   : > { %724 = vmatprep.subr.mxu1 %v381_v19 }
  0x2b   : > { %725 = vmatpush3.msra.mxu1 %v381_v19 }
  0xd1   : > { %v693_v25 = vpop.f32.mrf.mxu0 }
  0xd2   : > { %v376_v26 = vadd.f32 %v693_v25, %v645_v24 }
  0xd3   : > { %v370_v27 = vpop.f32.mrf.mxu0 }
  0xd4   : > { %v371_v28 = vadd.f32 %v645_v24, %v370_v27  ;;  %v380_v30 = vmax.f32 %v376_v26, 0.0 }
  0xd6   : > { %v379_v29 = vmax.f32 %v371_v28, 0.0 }
  0xd8   : > { %726 = vmatprep.mubr.f32.mxu1 %v379_v29 }
  0xd9   : > { %727 = vmatmul.mubr.f32.vlgmr.msra.gmra.mxu1 %v380_v30 }
 0x199   : > { %v728_v36 = vpop.f32.mrf.mxu1 }
 0x19a   : > { %v476_v37 = vadd.f32 %v728_v36, %v649_v35 }
 0x19b   : > { %v470_v38 = vpop.f32.mrf.mxu1 }
 0x19c   : > { %v471_v39 = vadd.f32 %v649_v35, %v470_v38  ;;  %v480_v41 = vmax.f32 %v476_v37, 0.0 }
 0x19e   : > { %v479_v40 = vmax.f32 %v471_v39, 0.0 }
 0x1a0   : > { %745 = vmatprep.mubr.msk.f32.mxu0 %vm496_vm2, %v479_v40 }
 0x1a1   : > { %746 = vmatmul.mubr.msk.f32.vlgmr.msra.gmra.mxu0 %vm496_vm2, %v480_v41 }
 0x261   : > { %v747_v42 = vpop.f32.mrf.mxu0 }
 0x262   : > { %v575_v46 = vadd.f32 %v747_v42, %v650_v43 }
 0x263   : > { %v569_v44 = vpop.f32.mrf.mxu0 }
 0x264   : > { %v570_v45 = vadd.f32 %v650_v43, %v569_v44  ;;  %579 = vst.msk [vmem:[%s280_s29 + $0x8] sm:$0xff] %vm293_vm1, %v575_v46 }
 0x266   : > { %578 = vst.msk [vmem:[%s280_s29] sm:$0xff] %vm293_vm1, %v570_v45 }
 0x267 PF: > { %s17_s24 = sadd.s32 1, %s762_s24  }
 0x268   : > { %p14_p4 = scmp.ge.s32.totalorder %s17_s24, 4  }
 0x26a   :  { %16 = sbr.rel (!%p14_p4) target bundleno = 1 (0x1), region = 78 }

</bundles_post_ra>
